<compile_context>
chip_gen: v7x
topology: tpu7x:2x2x1
jax: 0.10.0
libtpu: 0.0.40
codegen_flags: <defaults>
</compile_context>

<pallas_src>
import jax
import jax.numpy as jnp
from jax.experimental import pallas as pl
from jax.experimental.pallas import tpu as pltpu

EPS = 1e-12          # F.normalize eps
EPS2 = EPS * EPS     # clamp applied to squared norms (== clamping the norm)


def _gf_vlad_kernel(x_ref, w_ref, b_ref, c_ref, o_ref):
    # x_ref: (B, D, S)  NCHW feature block (spatial flattened), B samples
    # w_ref: (D, K)     1x1-conv weight, transposed
    # b_ref: (1, K)     conv bias
    # c_ref: (K, D)     cluster centroids
    # o_ref: (B, K*D)   lane-dense GF_VLAD features
    B, D, S = x_ref.shape
    K = c_ref.shape[0]

    x = x_ref[...].astype(jnp.float32)                      # (B, D, S)
    # Fused transpose to token-major layout; small on-chip tile (XLU).
    xt = jnp.transpose(x, (0, 2, 1))                        # (B, S, D)

    # ---- F.normalize over the descriptor dim (rsqrt on the EUP) ------------
    ssq = jnp.sum(xt * xt, axis=-1, keepdims=True)          # (B, S, 1)
    xn = xt * jax.lax.rsqrt(jnp.maximum(ssq, EPS2))         # (B, S, D)

    # ---- soft assignment: 1x1 conv == matmul, softmax over clusters --------
    xn2 = xn.reshape(B * S, D)
    logits = jnp.dot(xn2, w_ref[...],
                     preferred_element_type=jnp.float32) + b_ref[...]
    m = jnp.max(logits, axis=-1, keepdims=True)
    e = jnp.exp(logits - m)
    a = e * pl.reciprocal(jnp.sum(e, axis=-1, keepdims=True), approx=True)
    a3 = a.reshape(B, S, K)                                 # (B, S, K)

    # ---- VLAD aggregation: vlad[b,k,d] = sum_s a[b,s,k]*(xn[b,s,d]-c[k,d]) -
    agg = jnp.einsum('bsk,bsd->bkd', a3, xn,
                     preferred_element_type=jnp.float32)    # (B, K, D)
    asum = jnp.sum(a3, axis=1)                              # (B, K)
    vlad = agg - c_ref[...].astype(jnp.float32)[None] * asum[:, :, None]

    # ---- intra-normalization (per cluster, over D) --------------------------
    isq = jnp.sum(vlad * vlad, axis=-1, keepdims=True)      # (B, K, 1)
    vlad = vlad * jax.lax.rsqrt(jnp.maximum(isq, EPS2))

    # ---- global L2 over flattened (K*D) vector.  The GF_VLAD per-row
    # normalize that follows in the reference is identical to this divide
    # (and NaN-for-NaN for an all-zero sample), so it is folded away here. ---
    gsq = jnp.sum(vlad * vlad, axis=-1, keepdims=True)      # (B, K, 1)
    gsq = jnp.sum(gsq, axis=1, keepdims=True)               # (B, 1, 1)
    vlad = vlad * jax.lax.rsqrt(gsq)

    # Lane-dense store: last dim K*D (256) -> unmasked vst.
    o_ref[...] = vlad.reshape(B, K * D).astype(o_ref.dtype)


def _pick_batch_tile(n, max_tile=8):
    """Largest per-step batch tile that divides n and keeps the 2-D output
    BlockSpec legal (second-to-last block dim must be a multiple of 8 or equal
    the full dim)."""
    if n <= max_tile:
        return n
    for b in range(max_tile, 0, -1):
        if n % b == 0 and b % 8 == 0:
            return b
    return n


def netvlad_pallas(x_nds, weight_dk, bias_k, centroids_kd, *, max_batch_tile=8):
    """x_nds: (N, D, S) float32 (NCHW with spatial flattened) -> (N, K*D)."""
    N, D, S = x_nds.shape
    K = weight_dk.shape[1]
    B = _pick_batch_tile(N, max_batch_tile)
    bias_2d = bias_k.reshape(1, K)

    return pl.pallas_call(
        _gf_vlad_kernel,
        out_shape=jax.ShapeDtypeStruct((N, K * D), jnp.float32),
        grid_spec=pltpu.PrefetchScalarGridSpec(
            num_scalar_prefetch=0,
            grid=(N // B,),
            in_specs=[
                pl.BlockSpec((B, D, S), lambda i: (i, 0, 0)),
                # Constant block indices: params DMA'd once, not per step.
                pl.BlockSpec((D, K), lambda i: (0, 0)),
                pl.BlockSpec((1, K), lambda i: (0, 0)),
                pl.BlockSpec((K, D), lambda i: (0, 0)),
            ],
            out_specs=pl.BlockSpec((B, K * D), lambda i: (i, 0)),
        ),
        compiler_params=pltpu.CompilerParams(
            dimension_semantics=("parallel",)),
    )(x_nds, weight_dk, bias_2d, centroids_kd)


def gf_vlad_forward(feats_list, weight_dk, bias_k, centroids_kd):
    """feats_list: list of NCHW (N, D, H, W) arrays (PyTorch layout)."""
    # TODO(synk): nn.Dropout is identity in eval mode; training-mode RNG
    # masking is not implemented.
    outs = []
    for f in feats_list:
        n, d, h, w = f.shape
        # Free metadata reshape only; the D<->S transpose is fused in-kernel.
        outs.append(netvlad_pallas(f.reshape(n, d, h * w),
                                   weight_dk, bias_k, centroids_kd))
    # torch.cat(dim=0) on the tiny pooled outputs only; the final per-row L2
    # normalize is row-wise and already folded into the kernel.
    return jnp.concatenate(outs, axis=0)


def gf_vlad_reference(feats_list, weight_dk, bias_k, centroids_kd):
    """Pure-JAX reference mirroring the PyTorch NetVLAD + GF_VLAD math."""
    outs = []
    for f in feats_list:
        n, d, h, w = f.shape
        x = jnp.transpose(f.reshape(n, d, h * w), (0, 2, 1))          # (N,S,D)
        xn = x / jnp.maximum(
            jnp.linalg.norm(x, axis=-1, keepdims=True), EPS)
        logits = jnp.einsum('nsd,dk->nsk', xn, weight_dk) + bias_k
        a = jax.nn.softmax(logits, axis=-1)
        agg = jnp.einsum('nsk,nsd->nkd', a, xn)
        vlad = agg - centroids_kd[None] * jnp.sum(a, axis=1)[..., None]
        vlad = vlad / jnp.maximum(
            jnp.linalg.norm(vlad, axis=-1, keepdims=True), EPS)
        vlad = vlad.reshape(n, -1)
        vlad = vlad / jnp.maximum(
            jnp.linalg.norm(vlad, axis=-1, keepdims=True), EPS)
        outs.append(vlad)
    feats = jnp.concatenate(outs, axis=0)
    return feats / jnp.linalg.norm(feats, axis=1, keepdims=True)


if __name__ == "__main__":
    # cfg: drop_out=0.5 (identity at eval), vlad_cluster=8, vlad_dim=32
    K, D = 8, 32
    N, H, W = 2, 4, 4      # per-feature batch and spatial size (S = 16)

    key = jax.random.PRNGKey(0)
    k1, k2, k3, k4, k5 = jax.random.split(key, 5)

    # NetVLAD parameters: Conv2d(D, K, 1) weight/bias + centroids.
    conv_w = jax.random.normal(k1, (K, D), jnp.float32) * 0.1   # (K,D,1,1) squeezed
    conv_b = jax.random.normal(k2, (K,), jnp.float32) * 0.1
    centroids = jax.random.uniform(k3, (K, D), jnp.float32)     # torch.rand init
    weight_dk = conv_w.T                                         # (D, K) for x @ W^T

    # data_dict['feats']: list of NCHW feature maps.
    feats_list = [
        jax.random.normal(k4, (N, D, H, W), jnp.float32),
        jax.random.normal(k5, (N, D, H, W), jnp.float32),
    ]

    out = gf_vlad_forward(feats_list, weight_dk, conv_b, centroids)
    out = jax.block_until_ready(out)

    ref = gf_vlad_reference(feats_list, weight_dk, conv_b, centroids)
    assert out.shape == (2 * N, K * D), out.shape
    # Tolerance covers the approximate EUP reciprocal in the softmax denom.
    assert jnp.allclose(out, ref, atol=2e-3, rtol=2e-3), \
        float(jnp.max(jnp.abs(out - ref)))

    print("KERNEL_OK")
</pallas_src>

<mosaic_0001>
module attributes {stable_mosaic.version = 11 : i64} {
  func.func @_gf_vlad_kernel(%arg0: i32, %arg1: memref<2x32x16xf32, #tpu.memory_space<vmem>>, %arg2: memref<32x8xf32, #tpu.memory_space<vmem>>, %arg3: memref<1x8xf32, #tpu.memory_space<vmem>>, %arg4: memref<8x32xf32, #tpu.memory_space<vmem>>, %arg5: memref<2x256xf32, #tpu.memory_space<vmem>>) attributes {dimension_semantics = [#tpu.dimension_semantics<parallel>], iteration_bounds = array<i64: 1>, scalar_prefetch = 0 : i64, scratch_operands = 0 : i64, tpu.core_type = #tpu.core_type<tc>, window_params = [{transform_indices = @transform_0, window_bounds = array<i64: 2, 32, 16>}, {pipeline_mode = #tpu.pipeline_mode<synchronous>, transform_indices = @transform_1, window_bounds = array<i64: 32, 8>}, {pipeline_mode = #tpu.pipeline_mode<synchronous>, transform_indices = @transform_2, window_bounds = array<i64: 1, 8>}, {pipeline_mode = #tpu.pipeline_mode<synchronous>, transform_indices = @transform_3, window_bounds = array<i64: 8, 32>}, {transform_indices = @transform_4, window_bounds = array<i64: 2, 256>}]} {
    %c0 = arith.constant 0 : index
    %c0_0 = arith.constant 0 : index
    %c0_1 = arith.constant 0 : index
    %0 = vector.load %arg1[%c0, %c0_0, %c0_1] : memref<2x32x16xf32, #tpu.memory_space<vmem>>, vector<2x32x16xf32>
    %1 = tpu.transpose %0, [0, 2, 1] : vector<2x32x16xf32> -> vector<2x16x32xf32>
    %2 = arith.mulf %1, %1 : vector<2x16x32xf32>
    %cst = arith.constant dense<0.000000e+00> : vector<2x16xf32>
    %3 = vector.multi_reduction <add>, %2, %cst [2] : vector<2x16x32xf32> to vector<2x16xf32>
    %4 = vector.shape_cast %3 : vector<2x16xf32> to vector<2x16x1xf32>
    %cst_2 = arith.constant 1.000000e-24 : f32
    %5 = vector.broadcast %cst_2 : f32 to vector<2x16x1xf32>
    %6 = arith.maximumf %4, %5 : vector<2x16x1xf32>
    %7 = math.rsqrt %6 : vector<2x16x1xf32>
    %8 = vector.broadcast %7 : vector<2x16x1xf32> to vector<2x16x32xf32>
    %9 = arith.mulf %1, %8 : vector<2x16x32xf32>
    %10 = vector.shape_cast %9 : vector<2x16x32xf32> to vector<32x32xf32>
    %c0_3 = arith.constant 0 : index
    %c0_4 = arith.constant 0 : index
    %11 = vector.load %arg2[%c0_3, %c0_4] : memref<32x8xf32, #tpu.memory_space<vmem>>, vector<32x8xf32>
    %cst_5 = arith.constant dense<0.000000e+00> : vector<32x8xf32>
    %12 = tpu.matmul %10, %11, %cst_5 {dimension_numbers = #tpu.dot_dimension_numbers<[1], [0], [0], [1], [0, 0, 1, 1], [], []>} : vector<32x32xf32>, vector<32x8xf32>, vector<32x8xf32> -> vector<32x8xf32>
    %c0_6 = arith.constant 0 : index
    %c0_7 = arith.constant 0 : index
    %13 = vector.load %arg3[%c0_6, %c0_7] : memref<1x8xf32, #tpu.memory_space<vmem>>, vector<1x8xf32>
    %14 = vector.broadcast %13 : vector<1x8xf32> to vector<32x8xf32>
    %15 = arith.addf %12, %14 : vector<32x8xf32>
    %cst_8 = arith.constant dense<0xFF800000> : vector<32xf32>
    %16 = vector.multi_reduction <maximumf>, %15, %cst_8 [1] : vector<32x8xf32> to vector<32xf32>
    %17 = vector.shape_cast %16 : vector<32xf32> to vector<32x1xf32>
    %18 = vector.broadcast %17 : vector<32x1xf32> to vector<32x8xf32>
    %19 = arith.subf %15, %18 : vector<32x8xf32>
    %20 = math.exp %19 : vector<32x8xf32>
    %cst_9 = arith.constant dense<0.000000e+00> : vector<32xf32>
    %21 = vector.multi_reduction <add>, %20, %cst_9 [1] : vector<32x8xf32> to vector<32xf32>
    %22 = vector.shape_cast %21 : vector<32xf32> to vector<32x1xf32>
    %23 = tpu.reciprocal %22 {approx = true} : vector<32x1xf32> -> vector<32x1xf32>
    %24 = vector.broadcast %23 : vector<32x1xf32> to vector<32x8xf32>
    %25 = arith.mulf %20, %24 : vector<32x8xf32>
    %26 = vector.shape_cast %25 : vector<32x8xf32> to vector<2x16x8xf32>
    "tpu.trace_start"() <{level = 10 : i32, message = "bsk,bsd->bkd"}> : () -> ()
    %cst_10 = arith.constant dense<0.000000e+00> : vector<2x8x32xf32>
    %27 = tpu.matmul %26, %9, %cst_10 {dimension_numbers = #tpu.dot_dimension_numbers<[1], [1], [2], [2], [0, 0, 0, 2, 1, 2], [0], [0]>} : vector<2x16x8xf32>, vector<2x16x32xf32>, vector<2x8x32xf32> -> vector<2x8x32xf32>
    "tpu.trace_stop"() : () -> ()
    %cst_11 = arith.constant dense<0.000000e+00> : vector<2x8xf32>
    %28 = vector.multi_reduction <add>, %26, %cst_11 [1] : vector<2x16x8xf32> to vector<2x8xf32>
    %c0_12 = arith.constant 0 : index
    %c0_13 = arith.constant 0 : index
    %29 = vector.load %arg4[%c0_12, %c0_13] : memref<8x32xf32, #tpu.memory_space<vmem>>, vector<8x32xf32>
    %30 = vector.shape_cast %29 : vector<8x32xf32> to vector<1x8x32xf32>
    %31 = vector.shape_cast %28 : vector<2x8xf32> to vector<2x8x1xf32>
    %32 = vector.broadcast %30 : vector<1x8x32xf32> to vector<2x8x32xf32>
    %33 = vector.broadcast %31 : vector<2x8x1xf32> to vector<2x8x32xf32>
    %34 = arith.mulf %32, %33 : vector<2x8x32xf32>
    %35 = arith.subf %27, %34 : vector<2x8x32xf32>
    %36 = arith.mulf %35, %35 : vector<2x8x32xf32>
    %cst_14 = arith.constant dense<0.000000e+00> : vector<2x8xf32>
    %37 = vector.multi_reduction <add>, %36, %cst_14 [2] : vector<2x8x32xf32> to vector<2x8xf32>
    %38 = vector.shape_cast %37 : vector<2x8xf32> to vector<2x8x1xf32>
    %cst_15 = arith.constant 1.000000e-24 : f32
    %39 = vector.broadcast %cst_15 : f32 to vector<2x8x1xf32>
    %40 = arith.maximumf %38, %39 : vector<2x8x1xf32>
    %41 = math.rsqrt %40 : vector<2x8x1xf32>
    %42 = vector.broadcast %41 : vector<2x8x1xf32> to vector<2x8x32xf32>
    %43 = arith.mulf %35, %42 : vector<2x8x32xf32>
    %44 = arith.mulf %43, %43 : vector<2x8x32xf32>
    %cst_16 = arith.constant dense<0.000000e+00> : vector<2x8xf32>
    %45 = vector.multi_reduction <add>, %44, %cst_16 [2] : vector<2x8x32xf32> to vector<2x8xf32>
    %46 = vector.shape_cast %45 : vector<2x8xf32> to vector<2x8x1xf32>
    %cst_17 = arith.constant dense<0.000000e+00> : vector<2x1xf32>
    %47 = vector.multi_reduction <add>, %46, %cst_17 [1] : vector<2x8x1xf32> to vector<2x1xf32>
    %48 = vector.shape_cast %47 : vector<2x1xf32> to vector<2x1x1xf32>
    %49 = math.rsqrt %48 : vector<2x1x1xf32>
    %50 = vector.broadcast %49 : vector<2x1x1xf32> to vector<2x8x32xf32>
    %51 = arith.mulf %43, %50 : vector<2x8x32xf32>
    %52 = vector.shape_cast %51 : vector<2x8x32xf32> to vector<2x256xf32>
    %c0_18 = arith.constant 0 : index
    %c0_19 = arith.constant 0 : index
    %53 = vector.load %arg5[%c0_18, %c0_19] : memref<2x256xf32, #tpu.memory_space<vmem>>, vector<2x256xf32>
    tpu.vector_store %arg5[%c0_18, %c0_19], %52 {strides = array<i32>} : memref<2x256xf32, #tpu.memory_space<vmem>>, vector<2x256xf32>,
    return
  }
  func.func @transform_0(%arg0: i32) -> (i32, i32, i32) {
    %c0_i32 = arith.constant 0 : i32
    %c0_i32_0 = arith.constant 0 : i32
    %c0_i32_1 = arith.constant 0 : i32
    return %arg0, %c0_i32, %c0_i32_0 : i32, i32, i32
  }
  func.func @transform_1(%arg0: i32) -> (i32, i32) {
    %c0_i32 = arith.constant 0 : i32
    %c0_i32_0 = arith.constant 0 : i32
    %c0_i32_1 = arith.constant 0 : i32
    return %c0_i32, %c0_i32_0 : i32, i32
  }
  func.func @transform_2(%arg0: i32) -> (i32, i32) {
    %c0_i32 = arith.constant 0 : i32
    %c0_i32_0 = arith.constant 0 : i32
    %c0_i32_1 = arith.constant 0 : i32
    return %c0_i32, %c0_i32_0 : i32, i32
  }
  func.func @transform_3(%arg0: i32) -> (i32, i32) {
    %c0_i32 = arith.constant 0 : i32
    %c0_i32_0 = arith.constant 0 : i32
    %c0_i32_1 = arith.constant 0 : i32
    return %c0_i32, %c0_i32_0 : i32, i32
  }
  func.func @transform_4(%arg0: i32) -> (i32, i32) {
    %c0_i32 = arith.constant 0 : i32
    %c0_i32_0 = arith.constant 0 : i32
    return %arg0, %c0_i32 : i32, i32
  }
}

</mosaic_0001>

<bundles_post_ra>
// kernel: tpu_custom_call.1
= control target key start
LH: loop header
LB: loop body
LE: loop exit
PB: predicated region body
PF: predicated region fallthrough
CT: control target
= control target key end

     0   :  { %s938_s0 = inlined_call_operand.vmem [shape: f32[2,32,16], index: 0, kind: input, shape index: {}]   ;;  %s939_s1 = inlined_call_operand.vmem [shape: f32[32,8], index: 1, kind: input, shape index: {}]   ;;  %s940_s2 = inlined_call_operand.vmem [shape: f32[1,8], index: 2, kind: input, shape index: {}]   ;;  %s941_s3 = inlined_call_operand.vmem [shape: f32[8,32], index: 3, kind: input, shape index: {}]   ;;  %s942_s4 = inlined_call_operand.hbm [shape: f32[2,256], index: 4, kind: output, shape index: {}]  }
   0x1   :  { %v22_v0 = vld [vmem:[%s938_s0 + $0x20] sm:$0xff]  ;;  %v23_v2 = vld [vmem:[%s938_s0 + $0x28] sm:$0xff] }
   0x2   :  { %v18_v1 = vld [vmem:[%s938_s0] sm:$0xff]  ;;  %58 = vxpose.xlu1.b32.start [1/4] (short) (narrow) %v22_v0, 16  ;;  %v19_v3 = vld [vmem:[%s938_s0 + $0x8] sm:$0xff] }
   0x3   :  { %26 = vxpose.xlu0.b32.start [1/4] (short) (narrow) %v18_v1, 16 }
   0x4   :  { %9 = vsyncpa [#allocation3], 0  ;;  %v24_v4 = vld [vmem:[%s938_s0 + $0x30] sm:$0xff]  ;;  %v25_v6 = vld [vmem:[%s938_s0 + $0x38] sm:$0xff]  ;;  %vm94_vm0 = vcmask 261120   ;;  %v803_v26 = vmov 0.0|0.0  }
   0x5   :  { %v20_v5 = vld [vmem:[%s938_s0 + $0x10] sm:$0xff]  ;;  %v21_v7 = vld [vmem:[%s938_s0 + $0x18] sm:$0xff]  ;;  %v119_v20 = vld [vmem:[%s939_s1] sm:$0xff]  ;;  %732 = vmatprep.subr.bf16.mxu1 %v803_v26  ;;  %vm227_vm1 = vcmask 64512   ;;  %vm804_vm2 = vmmov 0   ;;  %vm304_vm3 = vcmask 130048  }
   0x6   :  { %59 = vxpose.xlu1.b32.cont [2/4] (short) (narrow) %v23_v2, 16  ;;  %v120_v21 = vld [vmem:[%s939_s1 + $0x8] sm:$0xff]  ;;  %v121_v23 = vld [vmem:[%s939_s1 + $0x10] sm:$0xff]  ;;  %v122_v24 = vld [vmem:[%s939_s1 + $0x18] sm:$0xff]  ;;  %s809_s14 = smov 32   ;;  %s810_s15 = smov 96  }
   0x7   :  { %27 = vxpose.xlu0.b32.cont [2/4] (short) (narrow) %v19_v3, 16  ;;  %v724_v22 = vpack.c.bf16 %v120_v21, %v119_v20  ;;  %v728_v25 = vpack.c.bf16 %v122_v24, %v121_v23  ;;  %v674_v45 = vld [vmem:[%s940_s2] ss:$0 sm:$0xff]  ;;  %vm641_vm4 = vcmask 523264   ;;  %vm643_vm5 = vcmask 785408   ;;  %s811_s16 = smov [#allocation2]  }
   0x8   :  { %s666_s17 = sshll.u32 %s811_s16, 4  ;;  %s667_s17 = int_to_ptr.vmem [resolvable:$true] %s666_s17 }
   0x9   :  { %725 = vmatprep.subr.bf16.mxu0 %v724_v22  ;;  %s779_s18 = scalar_lea.vmem %s667_s17, 64  ;;  %p784_p1 = scmp.lt.s32.totalorder %s667_s17, %s667_s17 }
   0xa   :  { %60 = vxpose.xlu1.b32.cont [3/4] (short) (narrow) %v24_v4, 16  ;;  %727 = vmatpush3.bf16.msra.mxu0 %v724_v22  ;;  %p780_p0 = scmp.ne.s32.totalorder %s667_s17, %s779_s18  ;;  %p785_p2 = scmp.lt.s32.totalorder %s779_s18, %s779_s18 }
   0xb   :  { %28 = vxpose.xlu0.b32.cont [3/4] (short) (narrow) %v20_v5, 16  ;;  %729 = vmatprep.subr.bf16.mxu0 %v728_v25 }
   0xc   :  { %p786_p3 = por %p785_p2, %p784_p1 }
   0xe   :  { %61 = vxpose.xlu1.b32.end [4/4] (short) (narrow) %v25_v6, 16  ;;  %731 = vmatpush3.bf16.msra.mxu0 %v728_v25  ;;  %p787_p4 = pnand %p786_p3, %p780_p0 }
   0xf   :  { %29 = vxpose.xlu0.b32.end [4/4] (short) (narrow) %v21_v7, 16 }
  0x82   :  { %v74_v8 = vpop.trf.xlu1 }
  0x83   :  { %v42_v9 = vpop.trf.xlu0  ;;  %v92_v10 = vmul.f32 %v74_v8, %v74_v8 }
  0x84   :  { %v90_v11 = vmul.f32 %v42_v9, %v42_v9 }
  0x85   :  { %v101_v12 = vsel %vm94_vm0, %v92_v10, 0.0 }
  0x86   :  { %v95_v13 = vsel %vm94_vm0, %v90_v11, 0.0  ;;  %102 = vadd.xlane.f32.xlu1 %v101_v12  ;;  %v75_v15 = vpop.trf.xlu1 }
  0x87   :  { %96 = vadd.xlane.f32.xlu0 %v95_v13  ;;  %v43_v14 = vpop.trf.xlu0  ;;  %v93_v17 = vmul.f32 %v75_v15, %v75_v15 }
  0x88   :  { %v91_v16 = vmul.f32 %v43_v14, %v43_v14 }
  0x89   :  { %v104_v19 = vsel %vm94_vm0, %v93_v17, 0.0 }
  0x8a   :  { %v98_v18 = vsel %vm94_vm0, %v91_v16, 0.0 }
  0x8b   :  { %99 = vadd.xlane.f32.xlu1 %v98_v18 }
  0x8f   :  { %105 = vadd.xlane.f32.xlu1 %v104_v19 }
 0x113   :  { %v103_v27 = vpop.xlane.xlu1 %102 }
 0x114   :  { %v97_v28 = vpop.xlane.xlu0 %96  ;;  %v109_v30 = vmax.f32 %v103_v27, 1e-24 }
 0x115   :  { %v107_v29 = vmax.f32 %v97_v28, 1e-24 }
 0x117   :  { %747 = vrsqrt.f32 %v107_v29 }
 0x118   :  { %v100_v31 = vpop.xlane.xlu1 %99  ;;  %749 = vrsqrt.f32 %v109_v30 }
 0x119   :  { %v108_v32 = vmax.f32 %v100_v31, 1e-24 }
 0x11b   :  { %751 = vrsqrt.f32 %v108_v32 }
 0x11c   :  { %v106_v33 = vpop.xlane.xlu1 %105 }
 0x11d   :  { %v110_v34 = vmax.f32 %v106_v33, 1e-24 }
 0x11f   :  { %753 = vrsqrt.f32 %v110_v34 }
 0x121   :  { %v748_v35 = vpop.eup %747 }
 0x122   :  { %v115_v36 = vmul.f32 %v748_v35, %v42_v9  ;;  %v750_v37 = vpop.eup %749 }
 0x123   :  { %v878_v40 = vmul.f32 %v750_v37, %v74_v8 }
 0x124   :  { %704 = vmatprep.mubr.msk.f32.mxu0 %vm94_vm0, %v115_v36 }
 0x125   :  { %v752_v38 = vpop.eup %751 }
 0x126   :  { %v116_v39 = vmul.f32 %v752_v38, %v43_v14  ;;  %v805_v14 = vmov 0.0  }
 0x127   :  { %714 = vmatprep.mubr.msk.f32.mxu1 %vm804_vm2, %v805_v14 }
 0x128   :  { %705 = vmatmul.mubr.msk.f32.vlgmr.msra.gmra.mrb[0].mxu0 %vm94_vm0, %v116_v39  ;;  %v733_v41 = vpack.c.bf16 %v116_v39, %v115_v36 }
 0x129   :  { %v754_v42 = vpop.eup %753  ;;  %707 = vmatprep.mubr.msk.f32.mxu0 %vm94_vm0, %v878_v40 }
 0x12a   :  { %734 = vmatpush3.bf16.msra.mxu1 %v733_v41  ;;  %v883_v43 = vmul.f32 %v754_v42, %v75_v15 }
 0x12b   :  { %735 = vmatprep.subr.bf16.mxu1 %v803_v26 }
 0x12c   :  { %708 = vmatmul.mubr.msk.f32.gmra.mrb[2].mxu0 %vm94_vm0, %v883_v43  ;;  %v736_v44 = vpack.c.bf16 %v883_v43, %v878_v40 }
 0x1fb   :  { %v706_v46 = vpop.f32.mrb[0].mxu0 }
 0x1fc   :  { %v214_v47 = vadd.f32 %v706_v46, %v674_v45  ;;  %v208_v48 = vpop.f32.mrb[1].mxu0 }
 0x1fd   :  { %v209_v49 = vadd.f32 %v674_v45, %v208_v48 }
 0x1fe   :  { %v231_v50 = vsel %vm227_vm1, %v214_v47, -inf }
 0x1ff   :  { %232 = vmax.xlane.f32.xlu1 %v231_v50  ;;  %v709_v51 = vpop.f32.mrb[2].mxu0  ;;  %v228_v52 = vsel %vm227_vm1, %v209_v49, -inf }
 0x200   :  { %v224_v53 = vadd.f32 %v709_v51, %v674_v45  ;;  %v218_v54 = vpop.f32.mrb[3].mxu0  ;;  %229 = vmax.xlane.f32.xlu0 %v228_v52  ;;  %v501_v51 = vld [vmem:[%s941_s3] sm:$0xff]  ;;  %s808_s3 = smov 64  }
 0x201   :  { %v219_v55 = vadd.f32 %v674_v45, %v218_v54 }
 0x202   :  { %v237_v56 = vsel %vm227_vm1, %v224_v53, -inf }
 0x203   :  { %238 = vmax.xlane.f32.xlu1 %v237_v56  ;;  %v234_v57 = vsel %vm227_vm1, %v219_v55, -inf }
 0x204   :  { %235 = vmax.xlane.f32.xlu0 %v234_v57 }
 0x28c   :  { %v233_v58 = vpop.xlane.xlu1 %232 }
 0x28d   :  { %v241_v59 = vsub.f32 %v214_v47, %v233_v58  ;;  %v230_v60 = vpop.xlane.xlu0 %229 }
 0x28e   :  { %v240_v61 = vsub.f32 %v209_v49, %v230_v60 }
 0x28f   :  { %v246_v62 = vmul.f32 1.442695, %v241_v59 }
 0x290   :  { %v244_v63 = vmul.f32 1.442695, %v240_v61  ;;  %v239_v0 = vpop.xlane.xlu1 %238 }
 0x291   :  { %755 = vpow2.f32 %v246_v62  ;;  %v243_v1 = vsub.f32 %v224_v53, %v239_v0  ;;  %v236_v2 = vpop.xlane.xlu0 %235 }
 0x292   :  { %757 = vpow2.f32 %v244_v63  ;;  %v242_v3 = vsub.f32 %v219_v55, %v236_v2 }
 0x293   :  { %v250_v4 = vmul.f32 1.442695, %v243_v1 }
 0x294   :  { %v248_v5 = vmul.f32 1.442695, %v242_v3 }
 0x295   :  { %759 = vpow2.f32 %v250_v4 }
 0x296   :  { %761 = vpow2.f32 %v248_v5 }
 0x29b   :  { %v756_v6 = vpop.eup %755 }
 0x29c   :  { %v758_v7 = vpop.eup %757  ;;  %v255_v8 = vsel %vm227_vm1, %v756_v6, 0.0 }
 0x29d   :  { %256 = vadd.xlane.f32.xlu1 %v255_v8  ;;  %v252_v9 = vsel %vm227_vm1, %v758_v7, 0.0 }
 0x29e   :  { %253 = vadd.xlane.f32.xlu0 %v252_v9 }
 0x29f   :  { %v760_v10 = vpop.eup %759 }
 0x2a0   :  { %v762_v11 = vpop.eup %761  ;;  %v261_v12 = vsel %vm227_vm1, %v760_v10, 0.0 }
 0x2a1   :  { %262 = vadd.xlane.f32.xlu1 %v261_v12  ;;  %v258_v13 = vsel %vm227_vm1, %v762_v11, 0.0 }
 0x2a2   :  { %259 = vadd.xlane.f32.xlu0 %v258_v13 }
 0x32a   :  { %v257_v15 = vpop.xlane.xlu1 %256 }
 0x32b   :  { %v254_v16 = vpop.xlane.xlu0 %253 }
 0x32c   :  { %763 = vrcp.f32 %v254_v16 }
 0x32d   :  { %765 = vrcp.f32 %v257_v15 }
 0x32e   :  { %v263_v17 = vpop.xlane.xlu1 %262 }
 0x32f   :  { %v260_v18 = vpop.xlane.xlu0 %259 }
 0x330   :  { %767 = vrcp.f32 %v260_v18 }
 0x331   :  { %769 = vrcp.f32 %v263_v17 }
 0x336   :  { %v764_v19 = vpop.eup %763 }
 0x337   :  { %v268_v20 = vmul.f32 %v764_v19, %v758_v7  ;;  %v766_v21 = vpop.eup %765 }
 0x338   :  { %v269_v24 = vmul.f32 %v766_v21, %v756_v6 }
 0x339   :  { %272 = vxpose.xlu0.b32.start [1/2] (short) (narrow) %v268_v20, 8  ;;  %v483_v31 = vsel %vm227_vm1, %v268_v20, 0.0 }
 0x33a   :  { %v768_v22 = vpop.eup %767  ;;  %v484_v30 = vsel %vm227_vm1, %v269_v24, 0.0 }
 0x33b   :  { %v770_v23 = vpop.eup %769  ;;  %v270_v25 = vmul.f32 %v768_v22, %v762_v11  ;;  %v485_v33 = vadd.f32 %v484_v30, %v483_v31  ;;  %v807_v30 = vmov 1934713408  }
 0x33c   :  { %v271_v26 = vmul.f32 %v770_v23, %v760_v10  ;;  %v583_v31 = vunpack.c.l.s4 %v807_v30 }
 0x33d   :  { %273 = vxpose.xlu0.b32.end [2/2] (short) (narrow) %v269_v24, 8  ;;  %378 = vxpose.xlu1.b32.start [1/2] (short) (narrow) %v270_v25, 8  ;;  %v492_v28 = vsel %vm227_vm1, %v270_v25, 0.0  ;;  %v486_v35 = vrot.slane %v485_v33, 4  ;;  %v806_v25 = vmov 1983009808  }
 0x33e   :  { %v493_v27 = vsel %vm227_vm1, %v271_v26, 0.0 }
 0x33f   :  { %v494_v29 = vadd.f32 %v493_v27, %v492_v28  ;;  %v487_v37 = vadd.f32 %v486_v35, %v485_v33  ;;  %v554_v27 = vlaneseq  ;;  %v584_v35 = vunpack.c.0.s8 %v583_v31 }
 0x341   :  { %379 = vxpose.xlu1.b32.end [2/2] (short) (narrow) %v271_v26, 8  ;;  %v495_v32 = vrot.slane %v494_v29, 4  ;;  %v488_v39 = vrot.slane %v487_v37, 2  ;;  %v552_v26 = vunpack.c.l.s4 %v806_v25 }
 0x343   :  { %v496_v34 = vadd.f32 %v495_v32, %v494_v29  ;;  %v489_v42 = vadd.f32 %v488_v39, %v487_v37  ;;  %v553_v28 = vunpack.c.0.s8 %v552_v26  ;;  %v555_v29 = vshrl.u32 %v554_v27, 7 }
 0x345   :  { %v497_v36 = vrot.slane %v496_v34, 2  ;;  %v490_v46 = vrot.slane %v489_v42, 1 }
 0x347   :  { %v498_v38 = vadd.f32 %v497_v36, %v496_v34  ;;  %v491_v47 = vadd.f32 %v490_v46, %v489_v42  ;;  %v556_v34 = vsub.s32 %v553_v28, %v555_v29  ;;  %v587_v42 = vsub.s32 %v584_v35, %v555_v29 }
 0x349   :  { %v499_v41 = vrot.slane %v498_v38, 1 }
 0x34b   :  { %v500_v45 = vadd.f32 %v499_v41, %v498_v38 }
 0x35f   :  { %506 = vbcast.lane.b32.xlu1 %v500_v45, 256 }
 0x366   :  { %503 = vbcast.lane.b32.xlu0 %v491_v47, 256 }
 0x3b9   :  { %v288_v48 = vpop.trf.xlu0 }
 0x3ba   :  { %715 = vmatmul.mubr.msk.f32.vlgmr.msra.gmra.mrb[0].mxu1 %vm304_vm3, %v288_v48 }
 0x3bb   :  { %737 = vmatpush3.bf16.msra.mxu1 %v736_v44  ;;  %721 = vmatprep.mubr.msk.f32.mxu1 %vm804_vm2, %v805_v14 }
 0x3bd   :  { %v394_v49 = vpop.trf.xlu1 }
 0x3be   :  { %722 = vmatmul.mubr.msk.f32.vlgmr.msra.gmra.mrb[2].mxu1 %vm304_vm3, %v394_v49 }
 0x3d1   :  { %v507_v53 = vpop.permute.xlu1 %506 }
 0x3d2   :  { %v509_v57 = vmul.f32 %v507_v53, %v501_v51 }
 0x3d8   :  { %v504_v50 = vpop.permute.xlu0 %503 }
 0x3d9   :  { %v508_v52 = vmul.f32 %v504_v50, %v501_v51 }
 0x48d   :  { %v374_v54 = vpop.f32.mrb[0].mxu1 }
 0x48e   :  { %v510_v55 = vsub.f32 %v374_v54, %v508_v52  ;;  %v716_v56 = vpop.f32.mrb[1].mxu1 }
 0x490   :  { %v512_v58 = vmul.f32 %v510_v55, %v510_v55 }
 0x491   :  { %v479_v59 = vpop.f32.mrb[2].mxu1 }
 0x492   :  { %v511_v40 = vsub.f32 %v479_v59, %v509_v57  ;;  %v723_v43 = vpop.f32.mrb[3].mxu1  ;;  %v514_v44 = vsel %vm94_vm0, %v512_v58, 0.0 }
 0x493   :  { %515 = vadd.xlane.f32.xlu1 %v514_v44 }
 0x494   :  { %v513_v60 = vmul.f32 %v511_v40, %v511_v40 }
 0x496   :  { %v517_v61 = vsel %vm94_vm0, %v513_v60, 0.0 }
 0x497   :  { %518 = vadd.xlane.f32.xlu0 %v517_v61 }
 0x520   :  { %v516_v62 = vpop.xlane.xlu1 %515 }
 0x521   :  { %v520_v63 = vmax.f32 %v516_v62, 1e-24 }
 0x523   :  { %771 = vrsqrt.f32 %v520_v63 }
 0x524   :  { %v519_v0 = vpop.xlane.xlu0 %518 }
 0x525   :  { %v521_v1 = vmax.f32 %v519_v0, 1e-24 }
 0x527   :  { %773 = vrsqrt.f32 %v521_v1 }
 0x52d   :  { %v772_v2 = vpop.eup %771 }
 0x52e   :  { %v524_v3 = vmul.f32 %v772_v2, %v510_v55 }
 0x530   :  { %v526_v4 = vmul.f32 %v524_v3, %v524_v3 }
 0x531   :  { %v774_v5 = vpop.eup %773 }
 0x532   :  { %v528_v6 = vsel %vm94_vm0, %v526_v4, 0.0  ;;  %v525_v7 = vmul.f32 %v774_v5, %v511_v40 }
 0x533   :  { %529 = vadd.xlane.f32.xlu0 %v528_v6 }
 0x534   :  { %v527_v8 = vmul.f32 %v525_v7, %v525_v7 }
 0x536   :  { %v531_v9 = vsel %vm94_vm0, %v527_v8, 0.0 }
 0x537   :  { %532 = vadd.xlane.f32.xlu1 %v531_v9 }
 0x5c0   :  { %v530_v10 = vpop.xlane.xlu0 %529 }
 0x5c1   :  { %v534_v11 = vrot.slane %v530_v10, 4 }
 0x5c3   :  { %v535_v12 = vadd.f32 %v534_v11, %v530_v10 }
 0x5c4   :  { %v533_v13 = vpop.xlane.xlu1 %532 }
 0x5c5   :  { %v536_v15 = vrot.slane %v535_v12, 2  ;;  %v540_v16 = vrot.slane %v533_v13, 4 }
 0x5c7   :  { %v537_v17 = vadd.f32 %v536_v15, %v535_v12  ;;  %v541_v18 = vadd.f32 %v540_v16, %v533_v13 }
 0x5c9   :  { %v538_v19 = vrot.slane %v537_v17, 1  ;;  %v542_v20 = vrot.slane %v541_v18, 2 }
 0x5cb   :  { %v539_v21 = vadd.f32 %v538_v19, %v537_v17  ;;  %v543_v22 = vadd.f32 %v542_v20, %v541_v18 }
 0x5cd   :  { %775 = vrsqrt.f32 %v539_v21  ;;  %v544_v23 = vrot.slane %v543_v22, 1 }
 0x5cf   :  { %v545_v24 = vadd.f32 %v544_v23, %v543_v22 }
 0x5d1   :  { %777 = vrsqrt.f32 %v545_v24 }
 0x5d7   :  { %v776_v32 = vpop.eup %775 }
 0x5d8   :  { %v548_v33 = vmul.f32 %v776_v32, %v524_v3 }
 0x5da   :  { %v550_v38 = vcombine.high %v548_v33, %v805_v14  ;;  %v557_v39 = vrot.slane %v548_v33, %v556_v34 }
 0x5db   :  { %v778_v36 = vpop.eup %777 }
 0x5dc   :  { %v549_v37 = vmul.f32 %v778_v36, %v525_v7  ;;  %v564_v48 = vrot.slane %v550_v38, %v556_v34 }
 0x5de   :  { %v572_v41 = vrot.slane %v549_v37, %v556_v34  ;;  %v565_v45 = vcombine.high %v549_v37, %v805_v14 }
 0x5e0   :  { %v581_v46 = vcombine.high %v557_v39, %v572_v41  ;;  %v580_v47 = vcombine.low %v557_v39, %v572_v41  ;;  %v579_v49 = vrot.slane %v565_v45, %v556_v34 }
 0x5e2   :  { %v595_v50 = vrot.slane %v581_v46, %v587_v42  ;;  %v588_v51 = vrot.slane %v580_v47, %v587_v42  ;;  %v596_v52 = vcombine.low %v564_v48, %v579_v49  ;;  %v597_v55 = vcombine.high %v564_v48, %v579_v49 }
 0x5e4   :  { %621 = vrot.lane.b32.xlu1 %v595_v50, %s808_s3  ;;  %v612_v53 = vcombine.high %v588_v51, %v805_v14  ;;  %v604_v54 = vrot.slane %v596_v52, %v587_v42  ;;  %v611_v57 = vrot.slane %v597_v55, %v587_v42  ;;  %v613_v58 = vcombine.high %v595_v50, %v805_v14 }
 0x5e6   :  { %617 = vrot.lane.b32.xlu0 %v612_v53, %s809_s14  ;;  %v614_v56 = vcombine.high %v604_v54, %v805_v14  ;;  %v615_v59 = vcombine.high %v611_v57, %v805_v14 }
 0x5e8   :  { %629 = vrot.lane.b32.xlu1 %v614_v56, %s809_s14 }
 0x5ea   :  { %633 = vrot.lane.b32.xlu0 %v611_v57, %s808_s3 }
 0x5ec   :  { %625 = vrot.lane.b32.xlu1 %v613_v58, %s810_s15 }
 0x5ee   :  { %637 = vrot.lane.b32.xlu0 %v615_v59, %s810_s15 }
 0x656   :  { %v622_v40 = vpop.permute.xlu1 %621 }
 0x658   :  { %v618_v43 = vpop.permute.xlu0 %617 }
 0x659   :  { %v640_v61 = vsel %vm94_vm0, %v588_v51, %v618_v43 }
 0x65a   :  { %v630_v44 = vpop.permute.xlu1 %629  ;;  %v642_v1 = vsel %vm641_vm4, %v640_v61, %v622_v40 }
 0x65b   :  { %v645_v62 = vsel %vm94_vm0, %v604_v54, %v630_v44 }
 0x65c   :  { %v634_v60 = vpop.permute.xlu0 %633 }
 0x65d   :  { %v646_v0 = vsel %vm641_vm4, %v645_v62, %v634_v60 }
 0x65e   :  { %v626_v63 = vpop.permute.xlu1 %625 }
 0x65f   :  { %v644_v3 = vsel %vm643_vm5, %v642_v1, %v626_v63 }
 0x660   :  { %v638_v2 = vpop.permute.xlu0 %637 }
 0x661   :  { %v647_v4 = vsel %vm643_vm5, %v646_v0, %v638_v2 }
 0x662   :  { %v650_v14 = vcombine.low %v644_v3, %v647_v4 }
 0x664   :  { %681 = vst.sshfl [vmem:[#allocation2] sm:$0x33 pattern:$0x76325410] %v650_v14 }
 0x665   :  { %790 = shalt.err (!%p787_p4)
}
 0x666   :  { %s791_s21 = scalar_lea.hbm %s942_s4, 64 }
 0x667   :  { %p792_p5 = scmp.ne.s32.totalorder %s942_s4, %s791_s21  ;;  %p795_p6 = scmp.lt.u32.totalorder %s791_s21, %s942_s4 }
 0x669   :  { %p797_p7 = pnand %p795_p6, %p792_p5 }
 0x66b   :  { %800 = shalt.err (!%p797_p7)
}
 0x66c   :  { %669 = dma.vmem_to_hbm [thread:$0]  %s667_s17, 64, %s942_s4, [#allocation3]  }
 0x66d   :  { %801 = dma.done.wait [#allocation3], 64  }
 0x66e   :  { %802 = vsyncadd [#allocation3], 4294967232 }
 0x66f   :  { %673 = vsyncpa [#allocation3], 1 }

</bundles_post_ra>
